<compile_context>
chip_gen: v5e
topology: v5e:2x2
jax: 0.10.0
libtpu: 0.0.40
codegen_flags: <defaults>
</compile_context>

<pallas_src>
import jax
import jax.numpy as jnp
from jax.experimental import pallas as pl
from jax.experimental.pallas import tpu as pltpu


def _round_up(n, m):
    return ((n + m - 1) // m) * m


def _pick_tm(B):
    """Batch tile: <=512 rows, multiple of 8, and >=2 grid steps when B >= 16
    (so v7x's second TensorCore gets work via the 'parallel' batch axis)."""
    if B < 16:
        return max(_round_up(B, 8), 8)
    for tm in (512, 256, 128, 64, 32, 16, 8):
        if pl.cdiv(B, tm) >= 2:
            return tm
    return 8


def mlp_kernel(x_ref, w1_ref, b1_ref, w2_ref, b2_ref, o_ref):
    # layer1: (tm, Kp) @ (Kp, Hp) -> (tm, Hp); bf16 MXU, f32 accumulate.
    h = jnp.dot(x_ref[...], w1_ref[...], preferred_element_type=jnp.float32)
    # layer2: bias + tanh in f32 (VPU + EUP).
    h = jnp.tanh(h + b1_ref[...])                      # (tm, Hp) + (1, Hp)
    # layer3: (tm, Hp) @ (Hp, Op) -> (tm, Op); cast h back to bf16 for the MXU.
    out = jnp.dot(h.astype(w2_ref.dtype), w2_ref[...],
                  preferred_element_type=jnp.float32)
    o_ref[...] = (out + b2_ref[...]).astype(o_ref.dtype)   # (tm, Op) + (1, Op)


def prepare_params(w1, b1, w2, b2, *, compute_dtype=jnp.bfloat16):
    """One-time parameter prep (outside the hot path):
       - transpose PyTorch (out, in) weights to (in, out),
       - cast weights to bf16 for MXU throughput (biases stay f32),
       - zero-pad every feature axis to a multiple of 128 (lane-dense)."""
    H, K = w1.shape
    O = w2.shape[0]
    Kp, Hp, Op = _round_up(K, 128), _round_up(H, 128), _round_up(O, 128)
    w1t = jnp.pad(w1.T.astype(compute_dtype), ((0, Kp - K), (0, Hp - H)))  # (Kp, Hp)
    w2t = jnp.pad(w2.T.astype(compute_dtype), ((0, Hp - H), (0, Op - O)))  # (Hp, Op)
    b1p = jnp.pad(b1.astype(jnp.float32), (0, Hp - H)).reshape(1, Hp)
    b2p = jnp.pad(b2.astype(jnp.float32), (0, Op - O)).reshape(1, Op)
    return w1t, b1p, w2t, b2p


def mlp_forward(x, w1t, b1p, w2t, b2p, num_output):
    """x: (B, num_input) f32.  Prepared params from prepare_params.
    Returns (B, num_output) in x.dtype."""
    B, K = x.shape
    Kp, Hp = w1t.shape
    Op = w2t.shape[1]
    out_dtype = x.dtype
    w_itemsize = jnp.dtype(w1t.dtype).itemsize
    o_itemsize = jnp.dtype(out_dtype).itemsize

    tm = _pick_tm(B)
    Bp = _round_up(B, tm)

    # Cast to the matmul dtype first (halves padded bytes), then jnp.pad
    # (fuses; avoids a full zeros+dynamic-update-slice copy of x in HBM).
    xc = x.astype(w1t.dtype)
    if (Bp, Kp) != (B, K):
        xc = jnp.pad(xc, ((0, Bp - B), (0, Kp - K)))

    grid = (Bp // tm,)

    # VMEM guardrail (matters when hidden sizes grow, esp. on v7x's 64 MiB VMEM
    # / v5e's 16 MiB scoped default): weights are conservatively counted twice
    # (default double-buffering) plus double-buffered x/out tiles.
    w_bytes = (Hp * Kp + Hp * Op) * w_itemsize
    io_bytes = 2 * tm * (Kp * w_itemsize + Op * o_itemsize)
    vmem_est = 2 * w_bytes + io_bytes + 2 * (Hp + Op) * 4
    compiler_kwargs = dict(dimension_semantics=("parallel",))
    if vmem_est > 16 * 1024 * 1024:
        compiler_kwargs["vmem_limit_bytes"] = min(int(vmem_est * 3 // 2),
                                                  100 * 1024 * 1024)

    cost = pl.CostEstimate(
        flops=2 * Bp * (Kp * Hp + Hp * Op),
        transcendentals=Bp * Hp,
        bytes_accessed=(Bp * Kp + Hp * Kp + Hp * Op) * w_itemsize
                       + (Hp + Op) * 4
                       + Bp * Op * o_itemsize,
    )

    out_p = pl.pallas_call(
        mlp_kernel,
        out_shape=jax.ShapeDtypeStruct((Bp, Op), out_dtype),
        grid=grid,
        in_specs=[
            pl.BlockSpec((tm, Kp), lambda i: (i, 0)),   # x: tiled over batch
            pl.BlockSpec((Kp, Hp), lambda i: (0, 0)),   # W1^T: resident across grid
            pl.BlockSpec((1, Hp), lambda i: (0, 0)),    # b1: resident
            pl.BlockSpec((Hp, Op), lambda i: (0, 0)),   # W2^T: resident
            pl.BlockSpec((1, Op), lambda i: (0, 0)),    # b2: resident
        ],
        out_specs=pl.BlockSpec((tm, Op), lambda i: (i, 0)),
        compiler_params=pltpu.CompilerParams(**compiler_kwargs),
        cost_estimate=cost,
    )(xc, w1t, b1p, w2t, b2p)

    return out_p[:B, :num_output]


def reference_forward(x, w1, b1, w2, b2):
    h = jnp.tanh(x @ w1.T + b1)
    return h @ w2.T + b2


if __name__ == "__main__":
    # Small shapes consistent with the module's forward: batch=8, in=32, hidden=64, out=16
    B, num_input, num_hidden, num_output = 8, 32, 64, 16

    key = jax.random.PRNGKey(0)
    k_x, k_w1, k_b1, k_w2, k_b2 = jax.random.split(key, 5)

    x = jax.random.normal(k_x, (B, num_input), dtype=jnp.float32)
    # Deterministic parameter init (mimics nn.Linear uniform init scale)
    lim1 = 1.0 / (num_input ** 0.5)
    lim2 = 1.0 / (num_hidden ** 0.5)
    w1 = jax.random.uniform(k_w1, (num_hidden, num_input), jnp.float32, -lim1, lim1)
    b1 = jax.random.uniform(k_b1, (num_hidden,), jnp.float32, -lim1, lim1)
    w2 = jax.random.uniform(k_w2, (num_output, num_hidden), jnp.float32, -lim2, lim2)
    b2 = jax.random.uniform(k_b2, (num_output,), jnp.float32, -lim2, lim2)

    # One-time parameter transpose / cast / padding (hoisted out of the forward path).
    w1t, b1p, w2t, b2p = prepare_params(w1, b1, w2, b2)
    w1t, b1p, w2t, b2p = jax.block_until_ready((w1t, b1p, w2t, b2p))

    out = mlp_forward(x, w1t, b1p, w2t, b2p, num_output)
    out = jax.block_until_ready(out)

    ref = reference_forward(x, w1, b1, w2, b2)
    assert out.shape == (B, num_output)
    # bf16 matmul inputs with f32 accumulation -> looser tolerance than pure f32.
    assert jnp.allclose(out, ref, atol=3e-2, rtol=3e-2)

    print("KERNEL_OK")
</pallas_src>

<mosaic_0001>
module attributes {stable_mosaic.version = 11 : i64} {
  func.func @mlp_kernel(%arg0: i32, %arg1: memref<8x128xbf16, #tpu.memory_space<vmem>>, %arg2: memref<128x128xbf16, #tpu.memory_space<vmem>>, %arg3: memref<1x128xf32, #tpu.memory_space<vmem>>, %arg4: memref<128x128xbf16, #tpu.memory_space<vmem>>, %arg5: memref<1x128xf32, #tpu.memory_space<vmem>>, %arg6: memref<8x128xf32, #tpu.memory_space<vmem>>) attributes {dimension_semantics = [#tpu.dimension_semantics<parallel>], iteration_bounds = array<i64: 1>, scalar_prefetch = 0 : i64, scratch_operands = 0 : i64, tpu.core_type = #tpu.core_type<tc>, window_params = [{transform_indices = @transform_0, window_bounds = array<i64: 8, 128>}, {pipeline_mode = #tpu.pipeline_mode<synchronous>, transform_indices = @transform_1, window_bounds = array<i64: 128, 128>}, {pipeline_mode = #tpu.pipeline_mode<synchronous>, transform_indices = @transform_2, window_bounds = array<i64: 1, 128>}, {pipeline_mode = #tpu.pipeline_mode<synchronous>, transform_indices = @transform_3, window_bounds = array<i64: 128, 128>}, {pipeline_mode = #tpu.pipeline_mode<synchronous>, transform_indices = @transform_4, window_bounds = array<i64: 1, 128>}, {transform_indices = @transform_5, window_bounds = array<i64: 8, 128>}]} {
    %c0 = arith.constant 0 : index
    %c0_0 = arith.constant 0 : index
    %0 = vector.load %arg1[%c0, %c0_0] : memref<8x128xbf16, #tpu.memory_space<vmem>>, vector<8x128xbf16>
    %c0_1 = arith.constant 0 : index
    %c0_2 = arith.constant 0 : index
    %1 = vector.load %arg2[%c0_1, %c0_2] : memref<128x128xbf16, #tpu.memory_space<vmem>>, vector<128x128xbf16>
    %cst = arith.constant dense<0.000000e+00> : vector<8x128xf32>
    %2 = tpu.matmul %0, %1, %cst {dimension_numbers = #tpu.dot_dimension_numbers<[1], [0], [0], [1], [0, 0, 1, 1], [], []>} : vector<8x128xbf16>, vector<128x128xbf16>, vector<8x128xf32> -> vector<8x128xf32>
    %c0_3 = arith.constant 0 : index
    %c0_4 = arith.constant 0 : index
    %3 = vector.load %arg3[%c0_3, %c0_4] : memref<1x128xf32, #tpu.memory_space<vmem>>, vector<1x128xf32>
    %4 = vector.broadcast %3 : vector<1x128xf32> to vector<8x128xf32>
    %5 = arith.addf %2, %4 : vector<8x128xf32>
    %6 = math.tanh %5 : vector<8x128xf32>
    %7 = arith.truncf %6 : vector<8x128xf32> to vector<8x128xbf16>
    %c0_5 = arith.constant 0 : index
    %c0_6 = arith.constant 0 : index
    %8 = vector.load %arg4[%c0_5, %c0_6] : memref<128x128xbf16, #tpu.memory_space<vmem>>, vector<128x128xbf16>
    %cst_7 = arith.constant dense<0.000000e+00> : vector<8x128xf32>
    %9 = tpu.matmul %7, %8, %cst_7 {dimension_numbers = #tpu.dot_dimension_numbers<[1], [0], [0], [1], [0, 0, 1, 1], [], []>} : vector<8x128xbf16>, vector<128x128xbf16>, vector<8x128xf32> -> vector<8x128xf32>
    %c0_8 = arith.constant 0 : index
    %c0_9 = arith.constant 0 : index
    %10 = vector.load %arg5[%c0_8, %c0_9] : memref<1x128xf32, #tpu.memory_space<vmem>>, vector<1x128xf32>
    %11 = vector.broadcast %10 : vector<1x128xf32> to vector<8x128xf32>
    %12 = arith.addf %9, %11 : vector<8x128xf32>
    %c0_10 = arith.constant 0 : index
    %c0_11 = arith.constant 0 : index
    %13 = vector.load %arg6[%c0_10, %c0_11] : memref<8x128xf32, #tpu.memory_space<vmem>>, vector<8x128xf32>
    tpu.vector_store %arg6[%c0_10, %c0_11], %12 {strides = array<i32>} : memref<8x128xf32, #tpu.memory_space<vmem>>, vector<8x128xf32>,
    return
  }
  func.func @transform_0(%arg0: i32) -> (i32, i32) {
    %c0_i32 = arith.constant 0 : i32
    %c0_i32_0 = arith.constant 0 : i32
    return %arg0, %c0_i32 : i32, i32
  }
  func.func @transform_1(%arg0: i32) -> (i32, i32) {
    %c0_i32 = arith.constant 0 : i32
    %c0_i32_0 = arith.constant 0 : i32
    %c0_i32_1 = arith.constant 0 : i32
    return %c0_i32, %c0_i32_0 : i32, i32
  }
  func.func @transform_2(%arg0: i32) -> (i32, i32) {
    %c0_i32 = arith.constant 0 : i32
    %c0_i32_0 = arith.constant 0 : i32
    %c0_i32_1 = arith.constant 0 : i32
    return %c0_i32, %c0_i32_0 : i32, i32
  }
  func.func @transform_3(%arg0: i32) -> (i32, i32) {
    %c0_i32 = arith.constant 0 : i32
    %c0_i32_0 = arith.constant 0 : i32
    %c0_i32_1 = arith.constant 0 : i32
    return %c0_i32, %c0_i32_0 : i32, i32
  }
  func.func @transform_4(%arg0: i32) -> (i32, i32) {
    %c0_i32 = arith.constant 0 : i32
    %c0_i32_0 = arith.constant 0 : i32
    %c0_i32_1 = arith.constant 0 : i32
    return %c0_i32, %c0_i32_0 : i32, i32
  }
  func.func @transform_5(%arg0: i32) -> (i32, i32) {
    %c0_i32 = arith.constant 0 : i32
    %c0_i32_0 = arith.constant 0 : i32
    return %arg0, %c0_i32 : i32, i32
  }
}

</mosaic_0001>

<bundles_post_ra>
// kernel: tpu_custom_call.1
= control target key start
LH: loop header
LB: loop body
LE: loop exit
PB: predicated region body
PF: predicated region fallthrough
CT: control target
= control target key end

     0   :  { %10 = vsyncpa [#allocation3], 0  ;;  %s496_s0 = inlined_call_operand.hbm [shape: bf16[8,128], index: 0, kind: input, shape index: {}]   ;;  %s497_s1 = inlined_call_operand.hbm [shape: bf16[128,128], index: 1, kind: input, shape index: {}]   ;;  %s498_s2 = inlined_call_operand.vmem [shape: f32[1,128], index: 2, kind: input, shape index: {}]   ;;  %s499_s3 = inlined_call_operand.hbm [shape: bf16[128,128], index: 3, kind: input, shape index: {}]   ;;  %s500_s4 = inlined_call_operand.vmem [shape: f32[1,128], index: 4, kind: input, shape index: {}]   ;;  %s501_s5 = inlined_call_operand.hbm [shape: f32[8,128], index: 5, kind: output, shape index: {}]  }
   0x1   :  { %11 = vsyncpa [#allocation6], 0  ;;  %s28_s20 = sshll.u32 %s497_s1, 4  ;;  %s29_s20 = int_to_ptr.hbm [resolvable:$true] %s28_s20 }
   0x2   :  { %12 = vsyncpa [#allocation4], 0  ;;  %s442_s21 = smov [#allocation5]   ;;  %s18_s25 = sshll.u32 %s496_s0, 4  ;;  %s19_s25 = int_to_ptr.hbm [resolvable:$true] %s18_s25 }
   0x3   :  { %s30_s22 = sshll.u32 %s442_s21, 4  ;;  %s443_s26 = smov 64   ;;  %s31_s22 = int_to_ptr.vmem [resolvable:$true] %s30_s22 }
   0x4   :  { %s444_s27 = smov 4   ;;  %s445_s28 = smov [#allocation2]  }
   0x5   :  { %36 = dma.hbm_to_vmem [thread:$0]  %s29_s20, 1024, %s31_s22, [#allocation6], %s443_s26, %s443_s26, %s444_s27  }
   0x6   :  { %s20_s29 = sshll.u32 %s445_s28, 4  ;;  %s43_s7 = sshll.u32 %s499_s3, 4  ;;  %s21_s29 = int_to_ptr.vmem [resolvable:$true] %s20_s29  ;;  %s44_s7 = int_to_ptr.hbm [resolvable:$true] %s43_s7 }
   0x7   :  { %23 = dma.hbm_to_vmem [thread:$0]  %s19_s25, 64, %s21_s29, [#allocation3]  }
   0x8   :  { %s446_s1 = smov [#allocation7]  }
   0x9   :  { %s45_s8 = sshll.u32 %s446_s1, 4  ;;  %s46_s8 = int_to_ptr.vmem [resolvable:$true] %s45_s8 }
   0xa   :  { %51 = dma.hbm_to_vmem [thread:$0]  %s44_s7, 1024, %s46_s8, [#allocation6], %s443_s26, %s443_s26, %s444_s27  }
   0xb   :  { %436 = dma.done.wait [#allocation3], 64  }
   0xc   :  { %437 = vsyncadd [#allocation3], 4294967232 }
   0xd   :  { %438 = dma.done.wait [#allocation6], 2048  }
   0xe   :  { %439 = vsyncadd [#allocation6], 4294965248  ;;  %v321_v0 = vld [vmem:[#allocation5 + $0x38] sm:$0xff]  ;;  %v320_v1 = vld [vmem:[#allocation5 + $0x30] sm:$0xff]  ;;  %s447_s11 = smov [#allocation8]   ;;  %s239_s15 = sshll.u32 %s501_s5, 4  ;;  %s240_s15 = int_to_ptr.hbm [resolvable:$true] %s239_s15 }
   0xf   :  { %135 = vmatpush.bf16.msra.mxu0 %v321_v0  ;;  %v329_v2 = vld [vmem:[#allocation7 + $0x38] sm:$0xff]  ;;  %v328_v3 = vld [vmem:[#allocation7 + $0x30] sm:$0xff]  ;;  %v319_v4 = vld [vmem:[#allocation5 + $0x28] sm:$0xff]  ;;  %s237_s12 = sshll.u32 %s447_s11, 4  ;;  %s238_s12 = int_to_ptr.vmem [resolvable:$true] %s237_s12 }
  0x10   :  { %218 = vmatpush.bf16.msra.mxu1 %v329_v2  ;;  %v327_v5 = vld [vmem:[#allocation7 + $0x28] sm:$0xff]  ;;  %v318_v6 = vld [vmem:[#allocation5 + $0x20] sm:$0xff]  ;;  %v317_v8 = vld [vmem:[#allocation5 + $0x18] sm:$0xff] }
  0x11   :  { %v326_v7 = vld [vmem:[#allocation7 + $0x20] sm:$0xff]  ;;  %v325_v9 = vld [vmem:[#allocation7 + $0x18] sm:$0xff]  ;;  %v316_v10 = vld [vmem:[#allocation5 + $0x10] sm:$0xff] }
  0x12   :  { %v315_v11 = vld [vmem:[#allocation5 + $0x8] sm:$0xff]  ;;  %v314_v12 = vld [vmem:[#allocation5] sm:$0xff]  ;;  %v66_v13 = vld [vmem:[#allocation2] sm:$0xf] }
  0x13   :  { %136 = vmatpush.bf16.msra.mxu0 %v320_v1  ;;  %v324_v14 = vld [vmem:[#allocation7 + $0x10] sm:$0xff]  ;;  %v323_v15 = vld [vmem:[#allocation7 + $0x8] sm:$0xff]  ;;  %v322_v16 = vld [vmem:[#allocation7] sm:$0xff] }
  0x14   :  { %219 = vmatpush.bf16.msra.mxu1 %v328_v3  ;;  %v336_v17 = vld [vmem:[%s498_s2] ss:$0 sm:$0xff] }
  0x15   :  { %v337_v23 = vld [vmem:[%s500_s4] ss:$0 sm:$0xff] }
  0x17   :  { %137 = vmatpush.bf16.msra.mxu0 %v319_v4 }
  0x18   :  { %220 = vmatpush.bf16.msra.mxu1 %v327_v5 }
  0x1b   :  { %138 = vmatpush.bf16.msra.mxu0 %v318_v6 }
  0x1c   :  { %221 = vmatpush.bf16.msra.mxu1 %v326_v7 }
  0x1f   :  { %139 = vmatpush.bf16.msra.mxu0 %v317_v8 }
  0x20   :  { %222 = vmatpush.bf16.msra.mxu1 %v325_v9 }
  0x23   :  { %140 = vmatpush.bf16.msra.mxu0 %v316_v10 }
  0x24   :  { %223 = vmatpush.bf16.msra.mxu1 %v324_v14 }
  0x27   :  { %141 = vmatpush.bf16.msra.mxu0 %v315_v11 }
  0x28   :  { %224 = vmatpush.bf16.msra.mxu1 %v323_v15 }
  0x2b   :  { %142 = vmatpush.bf16.msra.mxu0 %v314_v12 }
  0x2c   :  { %225 = vmatpush.bf16.msra.mxu1 %v322_v16 }
  0x2e   :  { %143 = vmatmul.bf16.vlgmr.msra.gmra.mxu0 %v66_v13 }
  0xab   :  { %v144_v18 = vpop.f32.mrf.mxu0 }
  0xac   :  { %v145_v19 = vadd.f32 %v336_v17, %v144_v18 }
  0xae   :  { %338 = vtanh.f32 %v145_v19 }
  0xb3   :  { %v146_v20 = vpop.f32.mrf.mxu0 }
  0xb4   :  { %v339_v21 = vpop.eup %338 }
  0xb5   :  { %v149_v22 = vpack.c.bf16 %v339_v21, %v339_v21 }
  0xb7   :  { %226 = vmatmul.bf16.vlgmr.msra.gmra.mxu1 %v149_v22 }
 0x134   :  { %v227_v24 = vpop.f32.mrf.mxu1 }
 0x135   :  { %v228_v25 = vadd.f32 %v337_v23, %v227_v24 }
 0x137   :  { %231 = vst [vmem:[#allocation8] sm:$0xff] %v228_v25 }
 0x138   :  { %242 = dma.vmem_to_hbm [thread:$0]  %s238_s12, 128, %s240_s15, [#allocation4]  }
 0x13c   :  { %v229_v26 = vpop.f32.mrf.mxu1 }
 0x13d   :  { %440 = dma.done.wait [#allocation4], 128  }
 0x13e   :  { %441 = vsyncadd [#allocation4], 4294967168 }
 0x13f   :  { %247 = vsyncpa [#allocation3], 1 }
 0x140   :  { %248 = vsyncpa [#allocation6], 1 }
 0x141   :  { %249 = vsyncpa [#allocation4], 1 }

</bundles_post_ra>
